<compile_context>
chip_gen: v5e
topology: v5e:2x2
jax: 0.10.0
libtpu: 0.0.40
codegen_flags: <defaults>
</compile_context>

<pallas_src>
import jax
import jax.numpy as jnp
from jax.experimental import pallas as pl
from jax.experimental.pallas import tpu as pltpu


# ----------------------------------------------------------------------------
# Constant builders (run ONCE per module in prepare_cup_block, not per forward).
# ----------------------------------------------------------------------------
def _upsample_matrix(n_in, n_out):
    """(n_out, n_in) bilinear interpolation matrix, align_corners=True
    (== nn.UpsamplingBilinear2d)."""
    step = (n_in - 1) / (n_out - 1) if n_out > 1 else 0.0
    src = jnp.arange(n_out, dtype=jnp.float32) * step
    i0 = jnp.clip(jnp.floor(src).astype(jnp.int32), 0, n_in - 1)
    i1 = jnp.minimum(i0 + 1, n_in - 1)
    f = src - i0.astype(jnp.float32)
    return (jax.nn.one_hot(i0, n_in, dtype=jnp.float32) * (1.0 - f)[:, None]
            + jax.nn.one_hot(i1, n_in, dtype=jnp.float32) * f[:, None])


def _banded_weights(w_hwio, wo, in_planar):
    """3x3 HWIO conv weight -> 3 banded (Toeplitz-along-W) matrices, bf16.

    The W-padding (pad=1) is baked into the band mask, so the conv input needs NO
    column halo and lives at lane offset 0.

    in_planar=True  : input lanes channel-planar (c*Wo + w), output lanes pixel-major
                      (j*Cout + o).   Shape (3, Cin*Wo, Wo*Cout).
    in_planar=False : input lanes pixel-major (w*Cin + c), output lanes channel-planar
                      (o*Wo + j).     Shape (3, Wo*Cin, Cout*Wo).
    """
    kh_n, kw_n, cin, cout = w_hwio.shape
    # input column w_in feeds output column j through tap kw = w_in - j + 1
    kw = jnp.arange(wo)[:, None] - jnp.arange(wo)[None, :] + 1          # (Wo_in, Wo_out)
    valid = (kw >= 0) & (kw < kw_n)
    d = w_hwio[:, jnp.clip(kw, 0, kw_n - 1)]                            # (3, Wo, Wo, Cin, Cout)
    d = jnp.where(valid[None, :, :, None, None], d, 0.0)
    if in_planar:
        b = jnp.transpose(d, (0, 3, 1, 2, 4)).reshape(kh_n, cin * wo, wo * cout)
    else:
        b = jnp.transpose(d, (0, 1, 3, 4, 2)).reshape(kh_n, wo * cin, cout * wo)
    return b.astype(jnp.bfloat16)


def prepare_cup_block(params, in_channels, H, W):
    """Build per-module constants (banded conv weights, upsample matrices, folded
    biases).  Depends only on params and the input spatial size -> call once."""
    Ho, Wo = 2 * H, 2 * W
    cout = params["w1"].shape[3]
    # Block-diagonal W-pass matrix: (Ho, Cin*W) @ (Cin*W, Cin*Wo) lands directly in
    # channel-planar (c*Wo + w) lane layout.
    uwt_blk = jnp.kron(jnp.eye(in_channels, dtype=jnp.float32),
                       _upsample_matrix(W, Wo).T)
    return dict(
        uh=_upsample_matrix(H, Ho).astype(jnp.bfloat16),                 # (Ho, H)
        uwt=uwt_blk.astype(jnp.bfloat16),                                # (Cin*W, Cin*Wo)
        w1b=_banded_weights(params["w1"], Wo, in_planar=True),           # (3, C1*Wo, Wo*Cout)
        w2b=_banded_weights(params["w2"], Wo, in_planar=False),          # (3, Cout*Wo, Cout*Wo)
        bias1=jnp.tile(params["b1"].astype(jnp.float32), Wo)[None, :],   # pixel-major
        bias2=jnp.repeat(params["b2"].astype(jnp.float32), Wo)[None, :], # channel-planar
    )


# ----------------------------------------------------------------------------
# Fused CUPBlock forward (single pallas_call).
# ----------------------------------------------------------------------------
def _cup_block_forward(x_nchw, x_s_nchw, consts):
    N, Cin, H, W = x_nchw.shape
    Ho, Wo = 2 * H, 2 * W
    Hp = Ho + 2                                   # H halo only (W pad baked into bands)
    has_skip = x_s_nchw is not None
    Cskip = x_s_nchw.shape[1] if has_skip else 0
    C1 = consts["w1b"].shape[1] // Wo
    Cout = consts["w2b"].shape[2] // Wo
    assert C1 == Cin + Cskip

    bf16 = jnp.bfloat16
    # Present lane-dense bf16 inputs: (N, H, Cin*W) with lanes c*W + w, and the skip
    # as (N, Ho, Cskip*Wo) with lanes s*Wo + w (matches q1's channel-planar interior).
    x_in = jnp.transpose(x_nchw.astype(bf16), (0, 2, 1, 3)).reshape(N, H, Cin * W)
    if has_skip:
        xs_in = jnp.transpose(x_s_nchw.astype(bf16), (0, 2, 1, 3)).reshape(N, Ho, Cskip * Wo)

    def kernel(*refs):
        if has_skip:
            (x_ref, xs_ref, uh_ref, uwt_ref,
             w1_ref, bb1_ref, w2_ref, bb2_ref, o_ref, q1_ref, q2_ref) = refs
        else:
            (x_ref, uh_ref, uwt_ref,
             w1_ref, bb1_ref, w2_ref, bb2_ref, o_ref, q1_ref, q2_ref) = refs
            xs_ref = None

        f32 = jnp.float32

        # Zero ONLY the two H-halo rows (interior is fully overwritten every step).
        # Not gated on program_id so it stays correct under "parallel" semantics.
        q1_ref[0:1, :] = jnp.zeros((1, C1 * Wo), bf16)
        q1_ref[Ho + 1:Ho + 2, :] = jnp.zeros((1, C1 * Wo), bf16)
        q2_ref[0:1, :] = jnp.zeros((1, Wo * Cout), bf16)
        q2_ref[Ho + 1:Ho + 2, :] = jnp.zeros((1, Wo * Cout), bf16)

        # -- bilinear x2 upsample (align_corners) on the MXU in bf16: H pass batched
        #    over all channels, W pass via the block-diagonal matrix -> result already
        #    in channel-planar (c*Wo + w) lanes.
        t = jnp.dot(uh_ref[...], x_ref[0], preferred_element_type=f32)       # (Ho, Cin*W)
        up = jnp.dot(t.astype(bf16), uwt_ref[...],
                     preferred_element_type=f32)                             # (Ho, Cin*Wo)

        # -- skip concat (torch.cat([up, skip], dim=1)); one dense lane-aligned store.
        if has_skip:
            interior1 = jnp.concatenate([up.astype(bf16), xs_ref[0]], axis=-1)
        else:
            interior1 = up.astype(bf16)                                      # (Ho, C1*Wo)
        q1_ref[1:Ho + 1, :] = interior1

        # -- conv1 (3x3, pad=1) + folded BN + ReLU: 3 banded bf16 matmuls, K = C1*Wo.
        #    acc initialized from the kh=0 dot; center tap uses the in-register value.
        acc1 = jnp.dot(q1_ref[0:Ho, :], w1_ref[0], preferred_element_type=f32)
        acc1 = acc1 + jnp.dot(interior1, w1_ref[1], preferred_element_type=f32)
        acc1 = acc1 + jnp.dot(q1_ref[2:Ho + 2, :], w1_ref[2], preferred_element_type=f32)
        r1 = jnp.maximum(acc1 + bb1_ref[...], 0.0)            # (Ho, Wo*Cout) pixel-major

        # -- conv1 result (+H halo) never leaves VMEM: one dense bf16 store.
        r1_bf = r1.astype(bf16)
        q2_ref[1:Ho + 1, :] = r1_bf

        # -- conv2 (3x3, pad=1) + folded BN + ReLU: 3 banded bf16 matmuls, K = Cout*Wo.
        acc2 = jnp.dot(q2_ref[0:Ho, :], w2_ref[0], preferred_element_type=f32)
        acc2 = acc2 + jnp.dot(r1_bf, w2_ref[1], preferred_element_type=f32)
        acc2 = acc2 + jnp.dot(q2_ref[2:Ho + 2, :], w2_ref[2], preferred_element_type=f32)
        y = jnp.maximum(acc2 + bb2_ref[...], 0.0)             # (Ho, Cout*Wo) channel-planar

        # -- single lane-dense output store (no per-channel masked stores).
        o_ref[0] = y.astype(o_ref.dtype)

    in_specs = [pl.BlockSpec((1, H, Cin * W), lambda b: (b, 0, 0))]
    inputs = [x_in]
    if has_skip:
        in_specs.append(pl.BlockSpec((1, Ho, Cskip * Wo), lambda b: (b, 0, 0)))
        inputs.append(xs_in)
    in_specs += [
        pl.BlockSpec((Ho, H), lambda b: (0, 0)),
        pl.BlockSpec((Cin * W, Cin * Wo), lambda b: (0, 0)),
        pl.BlockSpec((3, C1 * Wo, Wo * Cout), lambda b: (0, 0, 0)),
        pl.BlockSpec((1, Wo * Cout), lambda b: (0, 0)),
        pl.BlockSpec((3, Wo * Cout, Cout * Wo), lambda b: (0, 0, 0)),
        pl.BlockSpec((1, Cout * Wo), lambda b: (0, 0)),
    ]
    inputs += [consts["uh"], consts["uwt"], consts["w1b"], consts["bias1"],
               consts["w2b"], consts["bias2"]]

    out_flat = pl.pallas_call(
        kernel,
        out_shape=jax.ShapeDtypeStruct((N, Ho, Cout * Wo), jnp.bfloat16),
        grid_spec=pltpu.PrefetchScalarGridSpec(
            num_scalar_prefetch=0,
            grid=(N,),
            in_specs=in_specs,
            out_specs=pl.BlockSpec((1, Ho, Cout * Wo), lambda b: (b, 0, 0)),
            scratch_shapes=[
                pltpu.VMEM((Hp, C1 * Wo), jnp.bfloat16),    # conv1 input  (+ H halo)
                pltpu.VMEM((Hp, Wo * Cout), jnp.bfloat16),  # conv1 output (+ H halo)
            ],
        ),
        compiler_params=pltpu.CompilerParams(
            dimension_semantics=("parallel",),
            vmem_limit_bytes=32 * 1024 * 1024,
        ),
    )(*inputs)

    # Cheap wrapper-side layout fix-up to NCHW (output lanes are channel-planar o*Wo+j).
    out = out_flat.reshape(N, Ho, Cout, Wo)
    return jnp.transpose(out, (0, 2, 1, 3))                  # (N, Cout, Ho, Wo), bf16


cup_block_forward = jax.jit(_cup_block_forward)


# ----------------------------------------------------------------------------
# Parameters (deterministic synthetic init; BN eval-mode folded into W and bias).
# ----------------------------------------------------------------------------
def init_cup_block_params(key, in_channels, out_channels, skip_channels):
    skip_channels = skip_channels if skip_channels is not None else 0
    c1_in = in_channels + skip_channels
    eps = 1e-5
    params = {}
    for idx, (cin, cout) in enumerate([(c1_in, out_channels),
                                       (out_channels, out_channels)], start=1):
        key, kw_, kb, kg, kbt, km, kv = jax.random.split(key, 7)
        w = jax.random.normal(kw_, (3, 3, cin, cout), jnp.float32) * 0.1     # HWIO
        conv_b = jax.random.normal(kb, (cout,), jnp.float32) * 0.1
        gamma = 1.0 + 0.1 * jax.random.normal(kg, (cout,), jnp.float32)
        beta = 0.1 * jax.random.normal(kbt, (cout,), jnp.float32)
        mean = 0.1 * jax.random.normal(km, (cout,), jnp.float32)
        var = jnp.abs(jax.random.normal(kv, (cout,), jnp.float32)) + 0.5
        scale = gamma / jnp.sqrt(var + eps)
        params[f"w{idx}"] = w * scale[None, None, None, :]   # BN scale folded into weights
        params[f"b{idx}"] = beta + (conv_b - mean) * scale   # conv bias + BN shift folded
    return params


# ----------------------------------------------------------------------------
# Pure-JAX reference (numerical sanity check).
# ----------------------------------------------------------------------------
def _upsample_bilinear_x2_ref(x_nhwc):
    n, h, w, c = x_nhwc.shape
    ho, wo = 2 * h, 2 * w

    def coords(n_in, n_out):
        if n_in == 1:
            z = jnp.zeros((n_out,), jnp.int32)
            return z, z, jnp.zeros((n_out,), jnp.float32)
        src = jnp.arange(n_out, dtype=jnp.float32) * (n_in - 1) / (n_out - 1)
        i0 = jnp.floor(src).astype(jnp.int32)
        i1 = jnp.minimum(i0 + 1, n_in - 1)
        return i0, i1, src - i0.astype(jnp.float32)

    h0, h1, hf = coords(h, ho)
    w0, w1, wf = coords(w, wo)
    wf = wf[None, None, :, None]
    hf = hf[None, :, None, None]
    x00 = x_nhwc[:, h0][:, :, w0]
    x01 = x_nhwc[:, h0][:, :, w1]
    x10 = x_nhwc[:, h1][:, :, w0]
    x11 = x_nhwc[:, h1][:, :, w1]
    top = x00 * (1.0 - wf) + x01 * wf
    bot = x10 * (1.0 - wf) + x11 * wf
    return top * (1.0 - hf) + bot * hf


def cup_block_reference(x_nchw, x_s_nchw, params):
    x = jnp.transpose(x_nchw, (0, 2, 3, 1)).astype(jnp.float32)
    x = _upsample_bilinear_x2_ref(x)
    if x_s_nchw is not None:
        xs = jnp.transpose(x_s_nchw, (0, 2, 3, 1)).astype(jnp.float32)
        x = jnp.concatenate([x, xs], axis=-1)
    for i in (1, 2):
        x = jax.lax.conv_general_dilated(
            x, params[f"w{i}"], window_strides=(1, 1),
            padding=((1, 1), (1, 1)),
            dimension_numbers=("NHWC", "HWIO", "NHWC"))
        x = jnp.maximum(x + params[f"b{i}"], 0.0)
    return jnp.transpose(x, (0, 3, 1, 2))


if __name__ == "__main__":
    # Small shapes consistent with the module: batch=2, in_channels=4, skip_channels=4,
    # out_channels=8, input spatial 8x8 (skip and output are at 16x16).
    N, CIN, CSKIP, COUT, H, W = 2, 4, 4, 8, 8, 8

    key = jax.random.PRNGKey(0)
    key, kx, ks = jax.random.split(key, 3)
    x = jax.random.normal(kx, (N, CIN, H, W), jnp.float32)               # NCHW
    x_s = jax.random.normal(ks, (N, CSKIP, 2 * H, 2 * W), jnp.float32)   # NCHW skip

    params = init_cup_block_params(key, CIN, COUT, CSKIP)
    consts = prepare_cup_block(params, CIN, H, W)       # built once, reused every call

    out = cup_block_forward(x, x_s, consts)
    out = jax.block_until_ready(out)
    assert out.shape == (N, COUT, 2 * H, 2 * W), out.shape
    assert bool(jnp.all(out >= 0.0))                    # ReLU output is non-negative

    ref = cup_block_reference(x, x_s, params)
    # bf16 inputs / scratch / output -> slightly looser tolerance than pure-f32.
    max_err = float(jnp.max(jnp.abs(out.astype(jnp.float32) - ref)))
    assert max_err < 1.5e-1, f"max |pallas - reference| = {max_err}"

    print("KERNEL_OK")
</pallas_src>

<mosaic_0001>
module attributes {stable_mosaic.version = 11 : i64} {
  func.func @kernel(%arg0: i32, %arg1: memref<1x8x32xbf16, #tpu.memory_space<vmem>>, %arg2: memref<1x16x64xbf16, #tpu.memory_space<vmem>>, %arg3: memref<16x8xbf16, #tpu.memory_space<vmem>>, %arg4: memref<32x64xbf16, #tpu.memory_space<vmem>>, %arg5: memref<3x128x128xbf16, #tpu.memory_space<vmem>>, %arg6: memref<1x128xf32, #tpu.memory_space<vmem>>, %arg7: memref<3x128x128xbf16, #tpu.memory_space<vmem>>, %arg8: memref<1x128xf32, #tpu.memory_space<vmem>>, %arg9: memref<1x16x128xbf16, #tpu.memory_space<vmem>>, %arg10: memref<18x128xbf16, #tpu.memory_space<vmem>>, %arg11: memref<18x128xbf16, #tpu.memory_space<vmem>>) attributes {dimension_semantics = [#tpu.dimension_semantics<parallel>], iteration_bounds = array<i64: 2>, scalar_prefetch = 0 : i64, scratch_operands = 2 : i64, tpu.core_type = #tpu.core_type<tc>, window_params = [{transform_indices = @transform_0, window_bounds = array<i64: 1, 8, 32>}, {transform_indices = @transform_1, window_bounds = array<i64: 1, 16, 64>}, {pipeline_mode = #tpu.pipeline_mode<synchronous>, transform_indices = @transform_2, window_bounds = array<i64: 16, 8>}, {pipeline_mode = #tpu.pipeline_mode<synchronous>, transform_indices = @transform_3, window_bounds = array<i64: 32, 64>}, {pipeline_mode = #tpu.pipeline_mode<synchronous>, transform_indices = @transform_4, window_bounds = array<i64: 3, 128, 128>}, {pipeline_mode = #tpu.pipeline_mode<synchronous>, transform_indices = @transform_5, window_bounds = array<i64: 1, 128>}, {pipeline_mode = #tpu.pipeline_mode<synchronous>, transform_indices = @transform_6, window_bounds = array<i64: 3, 128, 128>}, {pipeline_mode = #tpu.pipeline_mode<synchronous>, transform_indices = @transform_7, window_bounds = array<i64: 1, 128>}, {transform_indices = @transform_8, window_bounds = array<i64: 1, 16, 128>}]} {
    %cst = arith.constant 0.000000e+00 : bf16
    %0 = vector.broadcast %cst : bf16 to vector<1x128xbf16>
    %c0 = arith.constant 0 : index
    %c0_0 = arith.constant 0 : index
    %1 = vector.load %arg10[%c0, %c0_0] : memref<18x128xbf16, #tpu.memory_space<vmem>>, vector<1x128xbf16>
    tpu.vector_store %arg10[%c0, %c0_0], %0 {strides = array<i32>} : memref<18x128xbf16, #tpu.memory_space<vmem>>, vector<1x128xbf16>,
    %cst_1 = arith.constant 0.000000e+00 : bf16
    %2 = vector.broadcast %cst_1 : bf16 to vector<1x128xbf16>
    %c17 = arith.constant 17 : index
    %c0_2 = arith.constant 0 : index
    %3 = vector.load %arg10[%c17, %c0_2] : memref<18x128xbf16, #tpu.memory_space<vmem>>, vector<1x128xbf16>
    tpu.vector_store %arg10[%c17, %c0_2], %2 {strides = array<i32>} : memref<18x128xbf16, #tpu.memory_space<vmem>>, vector<1x128xbf16>,
    %cst_3 = arith.constant 0.000000e+00 : bf16
    %4 = vector.broadcast %cst_3 : bf16 to vector<1x128xbf16>
    %c0_4 = arith.constant 0 : index
    %c0_5 = arith.constant 0 : index
    %5 = vector.load %arg11[%c0_4, %c0_5] : memref<18x128xbf16, #tpu.memory_space<vmem>>, vector<1x128xbf16>
    tpu.vector_store %arg11[%c0_4, %c0_5], %4 {strides = array<i32>} : memref<18x128xbf16, #tpu.memory_space<vmem>>, vector<1x128xbf16>,
    %cst_6 = arith.constant 0.000000e+00 : bf16
    %6 = vector.broadcast %cst_6 : bf16 to vector<1x128xbf16>
    %c17_7 = arith.constant 17 : index
    %c0_8 = arith.constant 0 : index
    %7 = vector.load %arg11[%c17_7, %c0_8] : memref<18x128xbf16, #tpu.memory_space<vmem>>, vector<1x128xbf16>
    tpu.vector_store %arg11[%c17_7, %c0_8], %6 {strides = array<i32>} : memref<18x128xbf16, #tpu.memory_space<vmem>>, vector<1x128xbf16>,
    %c0_9 = arith.constant 0 : index
    %c0_10 = arith.constant 0 : index
    %8 = vector.load %arg3[%c0_9, %c0_10] : memref<16x8xbf16, #tpu.memory_space<vmem>>, vector<16x8xbf16>
    %c0_11 = arith.constant 0 : index
    %c0_12 = arith.constant 0 : index
    %c0_13 = arith.constant 0 : index
    %9 = vector.load %arg1[%c0_11, %c0_12, %c0_13] : memref<1x8x32xbf16, #tpu.memory_space<vmem>>, vector<1x8x32xbf16>
    %10 = vector.shape_cast %9 : vector<1x8x32xbf16> to vector<8x32xbf16>
    %cst_14 = arith.constant dense<0.000000e+00> : vector<16x32xf32>
    %11 = tpu.matmul %8, %10, %cst_14 {dimension_numbers = #tpu.dot_dimension_numbers<[1], [0], [0], [1], [0, 0, 1, 1], [], []>} : vector<16x8xbf16>, vector<8x32xbf16>, vector<16x32xf32> -> vector<16x32xf32>
    %12 = arith.truncf %11 : vector<16x32xf32> to vector<16x32xbf16>
    %c0_15 = arith.constant 0 : index
    %c0_16 = arith.constant 0 : index
    %13 = vector.load %arg4[%c0_15, %c0_16] : memref<32x64xbf16, #tpu.memory_space<vmem>>, vector<32x64xbf16>
    %cst_17 = arith.constant dense<0.000000e+00> : vector<16x64xf32>
    %14 = tpu.matmul %12, %13, %cst_17 {dimension_numbers = #tpu.dot_dimension_numbers<[1], [0], [0], [1], [0, 0, 1, 1], [], []>} : vector<16x32xbf16>, vector<32x64xbf16>, vector<16x64xf32> -> vector<16x64xf32>
    %15 = arith.truncf %14 : vector<16x64xf32> to vector<16x64xbf16>
    %c0_18 = arith.constant 0 : index
    %c0_19 = arith.constant 0 : index
    %c0_20 = arith.constant 0 : index
    %16 = vector.load %arg2[%c0_18, %c0_19, %c0_20] : memref<1x16x64xbf16, #tpu.memory_space<vmem>>, vector<1x16x64xbf16>
    %17 = vector.shape_cast %16 : vector<1x16x64xbf16> to vector<16x64xbf16>
    %18 = tpu.concatenate %15, %17 in 1 : vector<16x64xbf16>, vector<16x64xbf16> -> vector<16x128xbf16>
    %c1 = arith.constant 1 : index
    %c0_21 = arith.constant 0 : index
    %19 = vector.load %arg10[%c1, %c0_21] : memref<18x128xbf16, #tpu.memory_space<vmem>>, vector<16x128xbf16>
    tpu.vector_store %arg10[%c1, %c0_21], %18 {strides = array<i32>} : memref<18x128xbf16, #tpu.memory_space<vmem>>, vector<16x128xbf16>,
    %c0_22 = arith.constant 0 : index
    %c0_23 = arith.constant 0 : index
    %20 = vector.load %arg10[%c0_22, %c0_23] : memref<18x128xbf16, #tpu.memory_space<vmem>>, vector<16x128xbf16>
    %c0_24 = arith.constant 0 : index
    %c0_25 = arith.constant 0 : index
    %c0_26 = arith.constant 0 : index
    %21 = vector.load %arg5[%c0_24, %c0_25, %c0_26] : memref<3x128x128xbf16, #tpu.memory_space<vmem>>, vector<1x128x128xbf16>
    %22 = vector.shape_cast %21 : vector<1x128x128xbf16> to vector<128x128xbf16>
    %cst_27 = arith.constant dense<0.000000e+00> : vector<16x128xf32>
    %23 = tpu.matmul %20, %22, %cst_27 {dimension_numbers = #tpu.dot_dimension_numbers<[1], [0], [0], [1], [0, 0, 1, 1], [], []>} : vector<16x128xbf16>, vector<128x128xbf16>, vector<16x128xf32> -> vector<16x128xf32>
    %c1_28 = arith.constant 1 : index
    %c0_29 = arith.constant 0 : index
    %c0_30 = arith.constant 0 : index
    %24 = vector.load %arg5[%c1_28, %c0_29, %c0_30] : memref<3x128x128xbf16, #tpu.memory_space<vmem>>, vector<1x128x128xbf16>
    %25 = vector.shape_cast %24 : vector<1x128x128xbf16> to vector<128x128xbf16>
    %cst_31 = arith.constant dense<0.000000e+00> : vector<16x128xf32>
    %26 = tpu.matmul %18, %25, %cst_31 {dimension_numbers = #tpu.dot_dimension_numbers<[1], [0], [0], [1], [0, 0, 1, 1], [], []>} : vector<16x128xbf16>, vector<128x128xbf16>, vector<16x128xf32> -> vector<16x128xf32>
    %27 = arith.addf %23, %26 : vector<16x128xf32>
    %c2 = arith.constant 2 : index
    %c0_32 = arith.constant 0 : index
    %28 = vector.load %arg10[%c2, %c0_32] : memref<18x128xbf16, #tpu.memory_space<vmem>>, vector<16x128xbf16>
    %c2_33 = arith.constant 2 : index
    %c0_34 = arith.constant 0 : index
    %c0_35 = arith.constant 0 : index
    %29 = vector.load %arg5[%c2_33, %c0_34, %c0_35] : memref<3x128x128xbf16, #tpu.memory_space<vmem>>, vector<1x128x128xbf16>
    %30 = vector.shape_cast %29 : vector<1x128x128xbf16> to vector<128x128xbf16>
    %cst_36 = arith.constant dense<0.000000e+00> : vector<16x128xf32>
    %31 = tpu.matmul %28, %30, %cst_36 {dimension_numbers = #tpu.dot_dimension_numbers<[1], [0], [0], [1], [0, 0, 1, 1], [], []>} : vector<16x128xbf16>, vector<128x128xbf16>, vector<16x128xf32> -> vector<16x128xf32>
    %32 = arith.addf %27, %31 : vector<16x128xf32>
    %c0_37 = arith.constant 0 : index
    %c0_38 = arith.constant 0 : index
    %33 = vector.load %arg6[%c0_37, %c0_38] : memref<1x128xf32, #tpu.memory_space<vmem>>, vector<1x128xf32>
    %34 = vector.broadcast %33 : vector<1x128xf32> to vector<16x128xf32>
    %35 = arith.addf %32, %34 : vector<16x128xf32>
    %cst_39 = arith.constant 0.000000e+00 : f32
    %36 = vector.broadcast %cst_39 : f32 to vector<16x128xf32>
    %37 = arith.maximumf %35, %36 : vector<16x128xf32>
    %38 = arith.truncf %37 : vector<16x128xf32> to vector<16x128xbf16>
    %c1_40 = arith.constant 1 : index
    %c0_41 = arith.constant 0 : index
    %39 = vector.load %arg11[%c1_40, %c0_41] : memref<18x128xbf16, #tpu.memory_space<vmem>>, vector<16x128xbf16>
    tpu.vector_store %arg11[%c1_40, %c0_41], %38 {strides = array<i32>} : memref<18x128xbf16, #tpu.memory_space<vmem>>, vector<16x128xbf16>,
    %c0_42 = arith.constant 0 : index
    %c0_43 = arith.constant 0 : index
    %40 = vector.load %arg11[%c0_42, %c0_43] : memref<18x128xbf16, #tpu.memory_space<vmem>>, vector<16x128xbf16>
    %c0_44 = arith.constant 0 : index
    %c0_45 = arith.constant 0 : index
    %c0_46 = arith.constant 0 : index
    %41 = vector.load %arg7[%c0_44, %c0_45, %c0_46] : memref<3x128x128xbf16, #tpu.memory_space<vmem>>, vector<1x128x128xbf16>
    %42 = vector.shape_cast %41 : vector<1x128x128xbf16> to vector<128x128xbf16>
    %cst_47 = arith.constant dense<0.000000e+00> : vector<16x128xf32>
    %43 = tpu.matmul %40, %42, %cst_47 {dimension_numbers = #tpu.dot_dimension_numbers<[1], [0], [0], [1], [0, 0, 1, 1], [], []>} : vector<16x128xbf16>, vector<128x128xbf16>, vector<16x128xf32> -> vector<16x128xf32>
    %c1_48 = arith.constant 1 : index
    %c0_49 = arith.constant 0 : index
    %c0_50 = arith.constant 0 : index
    %44 = vector.load %arg7[%c1_48, %c0_49, %c0_50] : memref<3x128x128xbf16, #tpu.memory_space<vmem>>, vector<1x128x128xbf16>
    %45 = vector.shape_cast %44 : vector<1x128x128xbf16> to vector<128x128xbf16>
    %cst_51 = arith.constant dense<0.000000e+00> : vector<16x128xf32>
    %46 = tpu.matmul %38, %45, %cst_51 {dimension_numbers = #tpu.dot_dimension_numbers<[1], [0], [0], [1], [0, 0, 1, 1], [], []>} : vector<16x128xbf16>, vector<128x128xbf16>, vector<16x128xf32> -> vector<16x128xf32>
    %47 = arith.addf %43, %46 : vector<16x128xf32>
    %c2_52 = arith.constant 2 : index
    %c0_53 = arith.constant 0 : index
    %48 = vector.load %arg11[%c2_52, %c0_53] : memref<18x128xbf16, #tpu.memory_space<vmem>>, vector<16x128xbf16>
    %c2_54 = arith.constant 2 : index
    %c0_55 = arith.constant 0 : index
    %c0_56 = arith.constant 0 : index
    %49 = vector.load %arg7[%c2_54, %c0_55, %c0_56] : memref<3x128x128xbf16, #tpu.memory_space<vmem>>, vector<1x128x128xbf16>
    %50 = vector.shape_cast %49 : vector<1x128x128xbf16> to vector<128x128xbf16>
    %cst_57 = arith.constant dense<0.000000e+00> : vector<16x128xf32>
    %51 = tpu.matmul %48, %50, %cst_57 {dimension_numbers = #tpu.dot_dimension_numbers<[1], [0], [0], [1], [0, 0, 1, 1], [], []>} : vector<16x128xbf16>, vector<128x128xbf16>, vector<16x128xf32> -> vector<16x128xf32>
    %52 = arith.addf %47, %51 : vector<16x128xf32>
    %c0_58 = arith.constant 0 : index
    %c0_59 = arith.constant 0 : index
    %53 = vector.load %arg8[%c0_58, %c0_59] : memref<1x128xf32, #tpu.memory_space<vmem>>, vector<1x128xf32>
    %54 = vector.broadcast %53 : vector<1x128xf32> to vector<16x128xf32>
    %55 = arith.addf %52, %54 : vector<16x128xf32>
    %cst_60 = arith.constant 0.000000e+00 : f32
    %56 = vector.broadcast %cst_60 : f32 to vector<16x128xf32>
    %57 = arith.maximumf %55, %56 : vector<16x128xf32>
    %58 = arith.truncf %57 : vector<16x128xf32> to vector<16x128xbf16>
    %c0_61 = arith.constant 0 : index
    %c0_62 = arith.constant 0 : index
    %c0_63 = arith.constant 0 : index
    %59 = vector.load %arg9[%c0_61, %c0_62, %c0_63] : memref<1x16x128xbf16, #tpu.memory_space<vmem>>, vector<1x16x128xbf16>
    %60 = vector.shape_cast %59 : vector<1x16x128xbf16> to vector<16x128xbf16>
    %61 = vector.shape_cast %58 : vector<16x128xbf16> to vector<1x16x128xbf16>
    tpu.vector_store %arg9[%c0_61, %c0_62, %c0_63], %61 {strides = array<i32>} : memref<1x16x128xbf16, #tpu.memory_space<vmem>>, vector<1x16x128xbf16>,
    return
  }
  func.func @transform_0(%arg0: i32) -> (i32, i32, i32) {
    %c0_i32 = arith.constant 0 : i32
    %c0_i32_0 = arith.constant 0 : i32
    %c0_i32_1 = arith.constant 0 : i32
    return %arg0, %c0_i32, %c0_i32_0 : i32, i32, i32
  }
  func.func @transform_1(%arg0: i32) -> (i32, i32, i32) {
    %c0_i32 = arith.constant 0 : i32
    %c0_i32_0 = arith.constant 0 : i32
    %c0_i32_1 = arith.constant 0 : i32
    return %arg0, %c0_i32, %c0_i32_0 : i32, i32, i32
  }
  func.func @transform_2(%arg0: i32) -> (i32, i32) {
    %c0_i32 = arith.constant 0 : i32
    %c0_i32_0 = arith.constant 0 : i32
    %c0_i32_1 = arith.constant 0 : i32
    return %c0_i32, %c0_i32_0 : i32, i32
  }
  func.func @transform_3(%arg0: i32) -> (i32, i32) {
    %c0_i32 = arith.constant 0 : i32
    %c0_i32_0 = arith.constant 0 : i32
    %c0_i32_1 = arith.constant 0 : i32
    return %c0_i32, %c0_i32_0 : i32, i32
  }
  func.func @transform_4(%arg0: i32) -> (i32, i32, i32) {
    %c0_i32 = arith.constant 0 : i32
    %c0_i32_0 = arith.constant 0 : i32
    %c0_i32_1 = arith.constant 0 : i32
    %c0_i32_2 = arith.constant 0 : i32
    return %c0_i32, %c0_i32_0, %c0_i32_1 : i32, i32, i32
  }
  func.func @transform_5(%arg0: i32) -> (i32, i32) {
    %c0_i32 = arith.constant 0 : i32
    %c0_i32_0 = arith.constant 0 : i32
    %c0_i32_1 = arith.constant 0 : i32
    return %c0_i32, %c0_i32_0 : i32, i32
  }
  func.func @transform_6(%arg0: i32) -> (i32, i32, i32) {
    %c0_i32 = arith.constant 0 : i32
    %c0_i32_0 = arith.constant 0 : i32
    %c0_i32_1 = arith.constant 0 : i32
    %c0_i32_2 = arith.constant 0 : i32
    return %c0_i32, %c0_i32_0, %c0_i32_1 : i32, i32, i32
  }
  func.func @transform_7(%arg0: i32) -> (i32, i32) {
    %c0_i32 = arith.constant 0 : i32
    %c0_i32_0 = arith.constant 0 : i32
    %c0_i32_1 = arith.constant 0 : i32
    return %c0_i32, %c0_i32_0 : i32, i32
  }
  func.func @transform_8(%arg0: i32) -> (i32, i32, i32) {
    %c0_i32 = arith.constant 0 : i32
    %c0_i32_0 = arith.constant 0 : i32
    %c0_i32_1 = arith.constant 0 : i32
    return %arg0, %c0_i32, %c0_i32_0 : i32, i32, i32
  }
}

</mosaic_0001>

<bundles_post_ra>
// kernel: _cup_block_forward.1
= control target key start
LH: loop header
LB: loop body
LE: loop exit
PB: predicated region body
PF: predicated region fallthrough
CT: control target
= control target key end

     0   :  { %s1538_s27 = smov 0   ;;  %s1757_s0 = inlined_call_operand.vmem [shape: bf16[2,8,32], index: 0, kind: input, shape index: {}]   ;;  %s1758_s1 = inlined_call_operand.vmem [shape: bf16[2,16,64], index: 1, kind: input, shape index: {}]   ;;  %s1759_s2 = inlined_call_operand.vmem [shape: bf16[16,8], index: 2, kind: input, shape index: {}]   ;;  %s1760_s3 = inlined_call_operand.vmem [shape: bf16[32,64], index: 3, kind: input, shape index: {}]   ;;  %s1761_s4 = inlined_call_operand.vmem [shape: bf16[3,128,128], index: 4, kind: input, shape index: {}]   ;;  %s1762_s5 = inlined_call_operand.vmem [shape: f32[1,128], index: 5, kind: input, shape index: {}]   ;;  %s1763_s6 = inlined_call_operand.vmem [shape: bf16[3,128,128], index: 6, kind: input, shape index: {}]   ;;  %s1764_s7 = inlined_call_operand.vmem [shape: f32[1,128], index: 7, kind: input, shape index: {}]   ;;  %s1765_s8 = inlined_call_operand.vmem [shape: bf16[2,16,128], index: 8, kind: output, shape index: {}]  }
   0x1 LB: > { %s1108_s28 = sadd.s32 4294967295, %s1490_s27   ;;  %p1112_p0 = scmp.ge.s32.totalorder %s1490_s27, 1  ;;  %s1490_s27 = sphi %s1538_s27, %s18_s27  }
   0x2   : > { %p271_p1 = scmp.lt.s32.totalorder %s1490_s27, 3 }
   0x4   : > { %p272_p2 = pnand %p1112_p0, %p271_p1 }
   0x5   : > { %p309_p3 = scmp.lt.s32.totalorder (!%p272_p2), %s1108_s28, 1  ;;  %s1492_s23 = smov (!%p272_p2), 64  }
   0x6   : > { %275 = sbr.rel (%p272_p2) target bundleno = 639 (0x27f), region = 52 }
   0xb   : > { %vm324_vm0 = vcmask 1040384   ;;  %vm325_vm1 = vsmask.f32 256  ;;  %v327_v0 = vld [vmem:[#allocation2] sm:$0x1]  ;;  %s1773_s28 = smov (!%p309_p3, %s1108_s28), 1 }
   0xc   : > { %vm1547_vm2 = vmand %vm324_vm0, %vm325_vm1  ;;  %vm330_vm3 = vsmask.f32 7938  ;;  %v332_v2 = vld [vmem:[#allocation2 + $0x8] sm:$0x1]  ;;  %v335_v3 = vld [vmem:[#allocation3] sm:$0x1] }
   0xd   : > { %v328_v4 = vsel %vm1547_vm2, 0, %v327_v0  ;;  %vm331_vm4 = vmand %vm324_vm0, %vm330_vm3  ;;  %v336_v5 = vsel %vm1547_vm2, 0, %v335_v3  ;;  %v338_v6 = vld [vmem:[#allocation3 + $0x8] sm:$0x1]  ;;  %vm353_vm5 = vcmask 1043456   ;;  %s1113_s29 = sshll.u32 %s1773_s28, 2 }
   0xe   : > { %329 = vst [vmem:[#allocation2] sm:$0x1] %v328_v4  ;;  %v333_v7 = vsel %vm331_vm4, 0, %v332_v2  ;;  %v339_v8 = vsel %vm331_vm4, 0, %v338_v6  ;;  %vm1557_vm6 = vmand %vm353_vm5, %vm330_vm3  ;;  %s312_s10 = scalar_lea.vmem %s1757_s0, %s1113_s29  ;;  %v1412_v12 = vld [vmem:[%s1759_s2] sm:$0xff]  ;;  %vm349_vm7 = vcmask 64512  }
   0xf   : > { %334 = vst [vmem:[#allocation2 + $0x8] sm:$0x1] %v333_v7  ;;  %v343_v10 = vld [vmem:[%s312_s10] sm:$0xf]  ;;  %v1414_v13 = vld [vmem:[%s1760_s3 + $0x8] sm:$0xff]  ;;  %s1410_s15 = sshll.u32 %s1773_s28, 3 }
  0x10   : > { %337 = vst [vmem:[#allocation3] sm:$0x1] %v336_v5  ;;  %v355_v11 = vsel %vm353_vm5, %v343_v10, 0  ;;  %398 = vmatpush.bf16.msra.mxu1 %v1414_v13  ;;  %v1413_v14 = vld [vmem:[%s1760_s3] sm:$0xff]  ;;  %s317_s20 = scalar_lea.vmem %s1758_s1, %s1410_s15  ;;  %v1432_v16 = vld [vmem:[%s1761_s4 + $0x78] sm:$0xff]  ;;  %v1431_v17 = vld [vmem:[%s1761_s4 + $0x70] sm:$0xff]  ;;  %s322_s9 = scalar_lea.vmem %s1765_s8, %s1410_s15 }
  0x11   : > { %340 = vst [vmem:[#allocation3 + $0x8] sm:$0x1] %v339_v8  ;;  %364 = vmatpush.bf16.msra.mxu0 %v355_v11  ;;  %v1415_v15 = vld [vmem:[%s317_s20] sm:$0xff]  ;;  %546 = vmatpush.bf16.msra.mxu2 %v1432_v16  ;;  %v1430_v18 = vld [vmem:[%s1761_s4 + $0x68] sm:$0xff]  ;;  %vm388_vm8 = vcmask 261120   ;;  %v1428_v23 = vld [vmem:[%s1761_s4 + $0x58] sm:$0xff] }
  0x12   : > { %420 = vrot.lane.b32.xlu0 %v1415_v15, %s1492_s23  ;;  %v1429_v19 = vld [vmem:[%s1761_s4 + $0x60] sm:$0xff]  ;;  %v1427_v24 = vld [vmem:[%s1761_s4 + $0x50] sm:$0xff]  ;;  %v1424_v25 = vld [vmem:[%s1761_s4 + $0x38] sm:$0xff]  ;;  %vm422_vm9 = vcmask 523264   ;;  %vm432_vm10 = vsmask.f32 4368 }
  0x13   : > { %614 = vmatpush.bf16.msra.mxu3 %v1424_v25  ;;  %v1426_v26 = vld [vmem:[%s1761_s4 + $0x48] sm:$0xff]  ;;  %v1423_v27 = vld [vmem:[%s1761_s4 + $0x30] sm:$0xff]  ;;  %v1441_v28 = vld [vmem:[%s1761_s4 + $0xb8] sm:$0xff]  ;;  %vm656_vm12 = vcmask 1046528  }
  0x14   : > { %1122 = vmatmul.msk.bf16.vlgmr.msra.gmra.mxu0 %vm349_vm7, %v1412_v12  ;;  %399 = vmatpush.bf16.msra.mxu1 %v1413_v14  ;;  %v1425_v29 = vld [vmem:[%s1761_s4 + $0x40] sm:$0xff]  ;;  %v1422_v30 = vld [vmem:[%s1761_s4 + $0x28] sm:$0xff]  ;;  %v1440_v31 = vld [vmem:[%s1761_s4 + $0xb0] sm:$0xff] }
  0x15   : > { %547 = vmatpush.bf16.msra.mxu2 %v1431_v17  ;;  %709 = vmatpush.bf16.msrb.mxu0 %v1441_v28  ;;  %v1421_v32 = vld [vmem:[%s1761_s4 + $0x20] sm:$0xff]  ;;  %v1439_v33 = vld [vmem:[%s1761_s4 + $0xa8] sm:$0xff]  ;;  %v1420_v34 = vld [vmem:[%s1761_s4 + $0x18] sm:$0xff] }
  0x16   : > { %v1438_v35 = vld [vmem:[%s1761_s4 + $0xa0] sm:$0xff]  ;;  %v1419_v36 = vld [vmem:[%s1761_s4 + $0x10] sm:$0xff]  ;;  %v1437_v37 = vld [vmem:[%s1761_s4 + $0x98] sm:$0xff] }
  0x17   : > { %615 = vmatpush.bf16.msra.mxu3 %v1423_v27  ;;  %v1418_v38 = vld [vmem:[%s1761_s4 + $0x8] sm:$0xff]  ;;  %v1436_v39 = vld [vmem:[%s1761_s4 + $0x90] sm:$0xff]  ;;  %v1417_v40 = vld [vmem:[%s1761_s4] sm:$0xff] }
  0x18   : > { %v1435_v42 = vld [vmem:[%s1761_s4 + $0x88] sm:$0xff]  ;;  %v1434_v43 = vld [vmem:[%s1761_s4 + $0x80] sm:$0xff]  ;;  %vm1653_vm11 = vmor %vm325_vm1, %vm432_vm10 }
  0x19   : > { %548 = vmatpush.bf16.msra.mxu2 %v1430_v18  ;;  %710 = vmatpush.bf16.msrb.mxu0 %v1440_v31  ;;  %v456_v63 = vld [vmem:[#allocation2] sm:$0xf]  ;;  %v460_v0 = vld [vmem:[#allocation2 + $0x8] sm:$0x1]  ;;  %v1454_v25 = vld [vmem:[%s1763_s6 + $0x58] sm:$0xff] }
  0x1a   : > { %v1467_v27 = vld [vmem:[%s1763_s6 + $0xb8] sm:$0xff]  ;;  %v1453_v28 = vld [vmem:[%s1763_s6 + $0x50] sm:$0xff]  ;;  %v1452_v31 = vld [vmem:[%s1763_s6 + $0x48] sm:$0xff] }
  0x1b   : > { %616 = vmatpush.bf16.msra.mxu3 %v1422_v30  ;;  %v1466_v30 = vld [vmem:[%s1763_s6 + $0xb0] sm:$0xff] }
  0x1d   : > { %549 = vmatpush.bf16.msra.mxu2 %v1429_v19  ;;  %711 = vmatpush.bf16.msrb.mxu0 %v1439_v33  ;;  %v1465_v33 = vld [vmem:[%s1763_s6 + $0xa8] sm:$0xff] }
  0x1f   : > { %617 = vmatpush.bf16.msra.mxu3 %v1421_v32  ;;  %v1447_v32 = vld [vmem:[%s1763_s6 + $0x20] sm:$0xff] }
  0x21   : > { %550 = vmatpush.bf16.msra.mxu2 %v1428_v23  ;;  %712 = vmatpush.bf16.msrb.mxu0 %v1438_v35  ;;  %v1455_v23 = vld [vmem:[%s1763_s6 + $0x60] sm:$0xff]  ;;  %v1446_v35 = vld [vmem:[%s1763_s6 + $0x18] sm:$0xff] }
  0x23   : > { %618 = vmatpush.bf16.msra.mxu3 %v1420_v34  ;;  %v1451_v34 = vld [vmem:[%s1763_s6 + $0x40] sm:$0xff] }
  0x25   : > { %551 = vmatpush.bf16.msra.mxu2 %v1427_v24  ;;  %713 = vmatpush.bf16.msrb.mxu0 %v1437_v37  ;;  %v1450_v24 = vld [vmem:[%s1763_s6 + $0x38] sm:$0xff]  ;;  %v1445_v37 = vld [vmem:[%s1763_s6 + $0x10] sm:$0xff] }
  0x27   : > { %619 = vmatpush.bf16.msra.mxu3 %v1419_v36  ;;  %v1464_v36 = vld [vmem:[%s1763_s6 + $0xa0] sm:$0xff] }
  0x29   : > { %552 = vmatpush.bf16.msra.mxu2 %v1426_v26  ;;  %714 = vmatpush.bf16.msrb.mxu0 %v1436_v39  ;;  %v1449_v26 = vld [vmem:[%s1763_s6 + $0x30] sm:$0xff]  ;;  %v1444_v39 = vld [vmem:[%s1763_s6 + $0x8] sm:$0xff] }
  0x2b   : > { %620 = vmatpush.bf16.msra.mxu3 %v1418_v38  ;;  %v1463_v38 = vld [vmem:[%s1763_s6 + $0x98] sm:$0xff] }
  0x2d   : > { %553 = vmatpush.bf16.msra.mxu2 %v1425_v29  ;;  %715 = vmatpush.bf16.msrb.mxu0 %v1435_v42  ;;  %v1448_v29 = vld [vmem:[%s1763_s6 + $0x28] sm:$0xff] }
  0x2f   : > { %621 = vmatpush.bf16.msra.mxu3 %v1417_v40  ;;  %v1462_v40 = vld [vmem:[%s1763_s6 + $0x90] sm:$0xff] }
  0x31   : > { %716 = vmatpush.bf16.msrb.mxu0 %v1434_v43  ;;  %919 = vmatpush.bf16.msrb.mxu2 %v1450_v24  ;;  %v1461_v43 = vld [vmem:[%s1763_s6 + $0x88] sm:$0xff] }
  0x33   : > { %1013 = vmatpush.bf16.msrb.mxu3 %v1467_v27 }
  0x35   : > { %920 = vmatpush.bf16.msrb.mxu2 %v1449_v26 }
  0x37   : > { %1014 = vmatpush.bf16.msrb.mxu3 %v1466_v30 }
  0x39   : > { %921 = vmatpush.bf16.msrb.mxu2 %v1448_v29 }
  0x3b   : > { %1015 = vmatpush.bf16.msrb.mxu3 %v1465_v33 }
  0x3d   : > { %922 = vmatpush.bf16.msrb.mxu2 %v1447_v32 }
  0x3f   : > { %1016 = vmatpush.bf16.msrb.mxu3 %v1464_v36 }
  0x41   : > { %923 = vmatpush.bf16.msrb.mxu2 %v1446_v35 }
  0x43   : > { %1017 = vmatpush.bf16.msrb.mxu3 %v1463_v38 }
  0x45   : > { %924 = vmatpush.bf16.msrb.mxu2 %v1445_v37 }
  0x47   : > { %1018 = vmatpush.bf16.msrb.mxu3 %v1462_v40 }
  0x49   : > { %925 = vmatpush.bf16.msrb.mxu2 %v1444_v39 }
  0x4b   : > { %1019 = vmatpush.bf16.msrb.mxu3 %v1461_v43 }
  0x84   : > { %v421_v49 = vpop.permute.xlu0 %420 }
  0x91   : > { %v366_v20 = vpop.f32.mrf.mxu0 }
  0x99   : > { %v368_v21 = vpop.f32.mrf.mxu0 }
  0x9a   : > { %v371_v22 = vpack.c.bf16 %v368_v21, %v366_v20  ;;  %v1458_v20 = vld [vmem:[%s1763_s6 + $0x78] sm:$0xff]  ;;  %v1457_v21 = vld [vmem:[%s1763_s6 + $0x70] sm:$0xff] }
  0x9b   : > { %851 = vmatpush.bf16.msrb.mxu1 %v1458_v20 }
  0x9c   : > { %1131 = vmatmul.msk.bf16.vlgmr.msra.gmra.mxu1 %vm388_vm8, %v371_v22  ;;  %v1456_v22 = vld [vmem:[%s1763_s6 + $0x68] sm:$0xff] }
  0x9f   : > { %852 = vmatpush.bf16.msrb.mxu1 %v1457_v21 }
  0xa3   : > { %853 = vmatpush.bf16.msrb.mxu1 %v1456_v22 }
  0xa7   : > { %854 = vmatpush.bf16.msrb.mxu1 %v1455_v23 }
  0xab   : > { %855 = vmatpush.bf16.msrb.mxu1 %v1454_v25 }
  0xaf   : > { %856 = vmatpush.bf16.msrb.mxu1 %v1453_v28 }
  0xb3   : > { %857 = vmatpush.bf16.msrb.mxu1 %v1452_v31  ;;  %v1483_v31 = vld [vmem:[%s1764_s7] ss:$0 sm:$0xff] }
  0xb7   : > { %858 = vmatpush.bf16.msrb.mxu1 %v1451_v34 }
 0x119   : > { %v401_v41 = vpop.f32.mrf.mxu1 }
 0x11a   : > { %v406_v44 = vpack.c.bf16 %v401_v41, %v401_v41  ;;  %v1443_v41 = vld [vmem:[%s1763_s6] sm:$0xff] }
 0x11b   : > { %926 = vmatpush.bf16.msrb.mxu2 %v1443_v41 }
 0x11c   : > { %v412_v47 = vunpack.c.l.b16 %v406_v44 }
 0x121   : > { %v403_v45 = vpop.f32.mrf.mxu1 }
 0x122   : > { %v407_v46 = vpack.c.bf16 %v403_v45, %v403_v45 }
 0x124   : > { %v413_v48 = vunpack.c.l.b16 %v407_v46 }
 0x126   : > { %v414_v50 = vpack.c.b16 %v413_v48, %v412_v47  ;;  %v1482_v47 = vld [vmem:[%s1762_s5] ss:$0 sm:$0xff] }
 0x128   : > { %v425_v51 = vsel %vm422_vm9, %v414_v50, %v421_v49  ;;  %v1460_v49 = vld [vmem:[%s1763_s6 + $0x80] sm:$0xff] }
 0x129   : > { %v428_v52 = vunpack.c.l.b16 %v425_v51  ;;  %v429_v53 = vunpack.c.h.b16 %v425_v51  ;;  %554 = vmatmul.bf16.vlgmr.msra.gmra.mxu2 %v425_v51  ;;  %1020 = vmatpush.bf16.msrb.mxu3 %v1460_v49 }
 0x12b   : > { %v430_v54 = vpack.c.b16 %v428_v52, %v428_v52  ;;  %v431_v55 = vpack.c.b16 %v429_v53, %v429_v53 }
 0x12d   : > { %v435_v56 = vshrl.u32 %v430_v54, 16  ;;  %v443_v57 = vshrl.u32 %v431_v55, 16  ;;  %v438_v59 = vshll.u32 %v430_v54, 16  ;;  %v446_v61 = vshll.u32 %v431_v55, 16 }
 0x12f   : > { %v437_v58 = vrot.slane %v435_v56, 7  ;;  %v445_v60 = vrot.slane %v443_v57, 7 }
 0x131   : > { %v440_v2 = vor.u32 %v438_v59, %v437_v58  ;;  %v441_v3 = vrot.slane %v437_v58, 4  ;;  %v448_v4 = vor.u32 %v446_v61, %v445_v60  ;;  %v450_v5 = vrot.slane %v445_v60, 4 }
 0x133   : > { %v449_v6 = vsel %vm1653_vm11, %v441_v3, %v448_v4  ;;  %v457_v7 = vsel %vm1557_vm6, %v440_v2, %v456_v63  ;;  %v461_v8 = vsel %vm1547_vm2, %v450_v5, %v460_v0  ;;  %v755_v63 = vld [vmem:[#allocation3] sm:$0xf] }
 0x134   : > { %458 = vst [vmem:[#allocation2] sm:$0xf] %v457_v7 }
 0x135   : > { %459 = vst [vmem:[#allocation2 + $0x4] sm:$0xf] %v449_v6 }
 0x136   : > { %462 = vst [vmem:[#allocation2 + $0x8] sm:$0x1] %v461_v8 }
 0x13b   : > { %v1238_v10 = vld [vmem:[#allocation2] sm:$0xe] }
 0x13c   : > { %v1416_v11 = vld [vmem:[#allocation2] sm:$0xff] }
 0x13d   : > { %v1433_v12 = vld [vmem:[#allocation2] sm:$0xf0]  ;;  %v630_v13 = vld [vmem:[#allocation2 + $0x8] sm:$0x1]  ;;  %622 = vmatmul.bf16.vlgmr.msra.gmra.mxu3 %v1416_v11 }
 0x13e   : > { %v653_v14 = vunpack.c.l.b16 %v630_v13  ;;  %v1239_v15 = vor.u32 %v1433_v12, %v1238_v10  ;;  %v759_v12 = vld [vmem:[#allocation3 + $0x8] sm:$0x1] }
 0x140   : > { %v655_v16 = vpack.c.b16 %v653_v14, %v653_v14  ;;  %v657_v17 = vrot.slane %v1239_v15, 1 }
 0x142   : > { %v658_v18 = vrot.slane %v655_v16, 1 }
 0x144   : > { %v659_v19 = vsel %vm656_vm12, %v657_v17, %v658_v18 }
 0x145   : > { %717 = vmatmul.bf16.vlgmr.msrb.gmra.mxu0 %v659_v19 }
 0x1ac   : > { %v555_v42 = vpop.f32.mrf.mxu2 }
 0x1b4   : > { %v557_v52 = vpop.f32.mrf.mxu2 }
 0x1c0   : > { %v623_v44 = vpop.f32.mrf.mxu3 }
 0x1c1   : > { %v624_v46 = vadd.f32 %v623_v44, %v555_v42 }
 0x1c2   : > { %v718_v45 = vpop.f32.mrf.mxu0 }
 0x1c3   : > { %v723_v48 = vadd.f32 %v718_v45, %v624_v46 }
 0x1c5   : > { %v729_v50 = vadd.f32 %v1482_v47, %v723_v48 }
 0x1c7   : > { %v731_v51 = vmax.f32 %v729_v50, 0.0 }
 0x1c8   : > { %v625_v53 = vpop.f32.mrf.mxu3 }
 0x1c9   : > { %v733_v54 = vpack.c.bf16 %v731_v51, %v731_v51  ;;  %v626_v55 = vadd.f32 %v625_v53, %v557_v52 }
 0x1ca   : > { %v720_v56 = vpop.f32.mrf.mxu0 }
 0x1cb   : > { %v736_v57 = vshrl.u32 %v733_v54, 16  ;;  %v724_v58 = vadd.f32 %v720_v56, %v626_v55  ;;  %v739_v60 = vshll.u32 %v733_v54, 16  ;;  %v799_v6 = vunpack.c.l.b16 %v733_v54 }
 0x1cd   : > { %v738_v59 = vrot.slane %v736_v57, 7  ;;  %v730_v61 = vadd.f32 %v1482_v47, %v724_v58 }
 0x1cf   : > { %v741_v0 = vor.u32 %v739_v60, %v738_v59  ;;  %v732_v2 = vmax.f32 %v730_v61, 0.0  ;;  %v742_v13 = vrot.slane %v738_v59, 4 }
 0x1d1   : > { %v756_v3 = vsel %vm1557_vm6, %v741_v0, %v755_v63  ;;  %v734_v4 = vpack.c.bf16 %v732_v2, %v732_v2 }
 0x1d2   : > { %757 = vst [vmem:[#allocation3] sm:$0xf] %v756_v3 }
 0x1d3   : > { %v744_v5 = vshrl.u32 %v734_v4, 16  ;;  %v800_v7 = vunpack.c.l.b16 %v734_v4  ;;  %v747_v10 = vshll.u32 %v734_v4, 16 }
 0x1d5   : > { %v746_v8 = vrot.slane %v744_v5, 7  ;;  %v801_v11 = vpack.c.b16 %v800_v7, %v799_v6 }
 0x1d7   : > { %v749_v14 = vor.u32 %v747_v10, %v746_v8  ;;  %v751_v15 = vrot.slane %v746_v8, 4  ;;  %859 = vmatmul.bf16.vlgmr.msrb.gmra.mxu1 %v801_v11 }
 0x1d9   : > { %v750_v16 = vsel %vm1653_vm11, %v742_v13, %v749_v14  ;;  %v760_v9 = vsel %vm1547_vm2, %v751_v15, %v759_v12  ;;  %v1374_v19 = vld [vmem:[#allocation3] sm:$0xe] }
 0x1da   : > { %758 = vst [vmem:[#allocation3 + $0x4] sm:$0xf] %v750_v16 }
 0x1db   : > { %761 = vst [vmem:[#allocation3 + $0x8] sm:$0x1] %v760_v9 }
 0x1e1   : > { %v1442_v17 = vld [vmem:[#allocation3] sm:$0xff] }
 0x1e2   : > { %v1459_v18 = vld [vmem:[#allocation3] sm:$0xf0]  ;;  %v935_v20 = vld [vmem:[#allocation3 + $0x8] sm:$0x1]  ;;  %927 = vmatmul.bf16.vlgmr.msrb.gmra.mxu2 %v1442_v17 }
 0x1e3   : > { %v958_v21 = vunpack.c.l.b16 %v935_v20  ;;  %v1375_v22 = vor.u32 %v1459_v18, %v1374_v19 }
 0x1e5   : > { %v960_v23 = vpack.c.b16 %v958_v21, %v958_v21  ;;  %v961_v24 = vrot.slane %v1375_v22, 1 }
 0x1e7   : > { %v962_v25 = vrot.slane %v960_v23, 1 }
 0x1e9   : > { %v963_v26 = vsel %vm656_vm12, %v961_v24, %v962_v25 }
 0x1ea   : > { %1021 = vmatmul.bf16.vlgmr.msrb.gmra.mxu3 %v963_v26 }
 0x254   : > { %v860_v27 = vpop.f32.mrf.mxu1 }
 0x25c   : > { %v862_v32 = vpop.f32.mrf.mxu1 }
 0x265   : > { %v928_v62 = vpop.f32.mrf.mxu2 }
 0x266   : > { %v929_v28 = vadd.f32 %v928_v62, %v860_v27 }
 0x26d   : > { %v1022_v1 = vpop.f32.mrf.mxu3  ;;  %v930_v29 = vpop.f32.mrf.mxu2 }
 0x26e   : > { %v1027_v30 = vadd.f32 %v1022_v1, %v929_v28  ;;  %v931_v33 = vadd.f32 %v930_v29, %v862_v32 }
 0x270   : > { %v1033_v35 = vadd.f32 %v1483_v31, %v1027_v30 }
 0x272   : > { %v1035_v38 = vmax.f32 %v1033_v35, 0.0 }
 0x275   : > { %v1024_v34 = vpop.f32.mrf.mxu3 }
 0x276   : > { %v1028_v36 = vadd.f32 %v1024_v34, %v931_v33 }
 0x278   : > { %v1034_v37 = vadd.f32 %v1483_v31, %v1028_v36 }
 0x27a   : > { %v1036_v39 = vmax.f32 %v1034_v37, 0.0 }
 0x27c   : > { %v1471_v40 = vpack.c.bf16 %v1036_v39, %v1035_v38 }
 0x27e   : > { %1472 = vst [vmem:[%s322_s9] sm:$0xff] %v1471_v40  }
 0x27f PF: > { %s18_s27 = sadd.s32 1, %s1490_s27  }
 0x280   : > { %p15_p4 = scmp.ge.s32.totalorder %s18_s27, 4  }
 0x282   :  { %17 = sbr.rel (!%p15_p4) target bundleno = 1 (0x1), region = 89 }

</bundles_post_ra>
